<compile_context>
chip_gen: v5e
topology: v5e:2x2
jax: 0.10.0
libtpu: 0.0.40
codegen_flags: <defaults>
</compile_context>

<pallas_src>
import functools
import math

import jax
import jax.numpy as jnp
from jax.experimental import pallas as pl
from jax.experimental.pallas import tpu as pltpu

SOFTPLUS_BETA = 100.0
SOFTPLUS_THRESHOLD = 20.0   # PyTorch Softplus default threshold (applied to beta*x)
MAX_TILE_N = 2048           # rows per grid step (lanes); multiple of 128


def _round_up(v, m):
    return -(-v // m) * m


def _softplus100(y):
    """PyTorch Softplus(beta=100): linear when beta*y > threshold."""
    z = SOFTPLUS_BETA * y
    z_safe = jnp.minimum(z, SOFTPLUS_THRESHOLD)           # avoid exp overflow in unused branch
    soft = jnp.log1p(jnp.exp(z_safe)) * jnp.float32(1.0 / SOFTPLUS_BETA)
    return jnp.where(z > SOFTPLUS_THRESHOLD, y, soft)


def _mlp_fused_kernel(*refs, layer_is_skip):
    """Fused MLP forward on one (dim_in, TILE_N) column tile (rows in lanes).

    refs = (xT_ref, *param_refs, oT_ref); per layer the params are
      plain layer: (w, b)            with w (dout, din), b (dout, 1)
      skip  layer: (w_main, w_skip, b)
    """
    xT_ref = refs[0]
    oT_ref = refs[-1]
    params = refs[1:-1]

    inp = xT_ref[...].astype(jnp.float32)     # (dim_in, TILE_N), stays resident in VMEM
    x = inp
    inv_sqrt2 = jnp.float32(1.0 / math.sqrt(2.0))
    n_linear = len(layer_is_skip)

    p = 0
    for layer, is_skip in enumerate(layer_is_skip):
        if is_skip:
            w_main = params[p][...]            # (dout, prev)
            w_skip = params[p + 1][...]        # (dout, dim_in)
            b = params[p + 2][...]             # (dout, 1)
            p += 3
            # (cat([x, inp], feat)/sqrt(2))^T @ W^T  ==  (W_main @ xT + W_skip @ inpT)/sqrt(2)
            y = (jnp.dot(w_main, x, preferred_element_type=jnp.float32)
                 + jnp.dot(w_skip, inp, preferred_element_type=jnp.float32)) * inv_sqrt2
        else:
            w = params[p][...]                 # (dout, din)
            b = params[p + 1][...]             # (dout, 1)
            p += 2
            y = jnp.dot(w, x, preferred_element_type=jnp.float32)
        y = y + b                              # (dout, 1) broadcasts over lanes (rows)
        if layer < n_linear - 1:
            y = _softplus100(y)
        x = y

    oT_ref[...] = x.astype(oT_ref.dtype)       # (dim_out, TILE_N): lane-dense store


def mlp_forward_pallas(inp, params, skip_in, dim_in, dim_out,
                       *, max_tile_n=MAX_TILE_N, interpret=False):
    """inp: (..., dim_in); params: list of (w (dout, din), b (dout,)) per layer
    in PyTorch nn.Linear layout."""
    lead_shape = inp.shape[:-1]
    x2d = inp.reshape(-1, dim_in)
    n = x2d.shape[0]

    # Rows live on the lane axis: pad N to a multiple of 128 and tile it.
    n_lanes = _round_up(max(n, 1), 128)
    tile_n = min(max_tile_n, n_lanes)
    if n_lanes > 128:
        # Aim for >= 2 grid steps so multi-TensorCore chips can split the row grid.
        tile_n = min(tile_n, max(128, _round_up(n_lanes // 2, 128)))
    n_padded = _round_up(n_lanes, tile_n)

    xT = x2d.T                                            # (dim_in, N)
    if n_padded != n:
        xT = jnp.pad(xT, ((0, 0), (0, n_padded - n)))

    # Build operand list + static per-layer descriptors.  Skip-layer weights are
    # split once here so the concat never exists anywhere.
    operands = []
    in_specs = [pl.BlockSpec((dim_in, tile_n), lambda i: (0, i))]
    layer_is_skip = []

    def const_spec(shape):
        return pl.BlockSpec(shape, lambda i: (0, 0))      # resident across grid steps

    flops = 0
    transcendentals = 0
    param_bytes = 0
    n_layers = len(params)
    for layer, (w, b) in enumerate(params):
        is_skip = layer in skip_in
        layer_is_skip.append(is_skip)
        dout, din = w.shape
        b2 = b.reshape(dout, 1)
        if is_skip:
            prev = din - dim_in
            w_main, w_skip = w[:, :prev], w[:, prev:]     # [x, inp] concat order
            operands += [w_main, w_skip, b2]
            in_specs += [const_spec(w_main.shape), const_spec(w_skip.shape),
                         const_spec((dout, 1))]
        else:
            operands += [w, b2]
            in_specs += [const_spec(w.shape), const_spec((dout, 1))]
        flops += 2 * dout * din * n_padded
        if layer < n_layers - 1:
            transcendentals += 2 * dout * n_padded        # exp + log1p per element
        param_bytes += w.size * w.dtype.itemsize + b.size * b.dtype.itemsize

    cost = pl.CostEstimate(
        flops=flops,
        transcendentals=transcendentals,
        bytes_accessed=(xT.size * xT.dtype.itemsize
                        + n_padded * dim_out * inp.dtype.itemsize
                        + param_bytes),
    )

    kernel = functools.partial(_mlp_fused_kernel, layer_is_skip=tuple(layer_is_skip))
    outT = pl.pallas_call(
        kernel,
        out_shape=jax.ShapeDtypeStruct((dim_out, n_padded), inp.dtype),
        grid=(n_padded // tile_n,),
        in_specs=in_specs,
        out_specs=pl.BlockSpec((dim_out, tile_n), lambda i: (0, i)),
        compiler_params=pltpu.CompilerParams(
            dimension_semantics=("parallel",),
        ),
        cost_estimate=cost,
        interpret=interpret,
    )(xT, *operands)

    out = outT[:, :n].T                                   # (n, dim_out)
    return out.reshape(*lead_shape, dim_out)


class MLPNetPallas:
    """JAX/Pallas re-implementation of the PyTorch MLPNet forward pass."""

    def __init__(self, dim_in, dim_hidden, dim_out, skip_in=(), final_activation=None,
                 key=None):
        # final_activation accepted for signature parity; never used (as in PyTorch).
        dims = [dim_in] + list(dim_hidden) + [dim_out]
        self.num_layers = len(dims)
        self.skip_in = tuple(skip_in)
        self.dim_in = dim_in
        self.dim_out = dim_out
        self.params = []                                   # (w (dout, din), b (dout,))
        key = jax.random.PRNGKey(0) if key is None else key
        for layer in range(self.num_layers - 1):
            if layer + 1 in self.skip_in:
                out_dim = dims[layer + 1] - dim_in
            else:
                out_dim = dims[layer + 1]
            in_dim = dims[layer]
            key, wk, bk = jax.random.split(key, 3)
            bound = 1.0 / math.sqrt(in_dim)     # PyTorch nn.Linear default init range
            w = jax.random.uniform(wk, (out_dim, in_dim), jnp.float32, -bound, bound)
            b = jax.random.uniform(bk, (out_dim,), jnp.float32, -bound, bound)
            self.params.append((w, b))

    def __call__(self, inp):
        return mlp_forward_pallas(inp, self.params, self.skip_in,
                                  self.dim_in, self.dim_out)


def _reference_forward(net, inp):
    """Pure-JAX reference matching PyTorch exactly (concat-based skip)."""
    x2d = inp.reshape(-1, net.dim_in)
    x = x2d
    for layer, (w, b) in enumerate(net.params):
        if layer in net.skip_in:
            x = jnp.concatenate([x, x2d], axis=-1) / jnp.sqrt(2.0)
        y = x @ w.T + b
        if layer < net.num_layers - 2:
            y = _softplus100(y)
        x = y
    return x.reshape(*inp.shape[:-1], x.shape[-1])


if __name__ == "__main__":
    # Small SDF-MLP style config: dims = [6, 32, 32, 32, 1], skip at layer 2.
    dim_in, dim_hidden, dim_out, skip_in = 6, [32, 32, 32], 1, (2,)
    net = MLPNetPallas(dim_in, dim_hidden, dim_out, skip_in=skip_in,
                       key=jax.random.PRNGKey(0))

    # Case 1: flat batch.
    x1 = jax.random.normal(jax.random.PRNGKey(0), (16, dim_in), dtype=jnp.float32)
    out1 = jax.block_until_ready(net(x1))
    ref1 = _reference_forward(net, x1)
    assert out1.shape == (16, dim_out), out1.shape
    assert jnp.allclose(out1, ref1, atol=1e-4, rtol=1e-4), "mismatch vs reference (case 1)"

    # Case 2: leading batch dims + row count not a multiple of 128 (exercises padding).
    x2 = jax.random.normal(jax.random.PRNGKey(1), (2, 50, dim_in), dtype=jnp.float32)
    out2 = jax.block_until_ready(net(x2))
    ref2 = _reference_forward(net, x2)
    assert out2.shape == (2, 50, dim_out), out2.shape
    assert jnp.allclose(out2, ref2, atol=1e-4, rtol=1e-4), "mismatch vs reference (case 2)"

    # Case 3: larger batch -> multi-step grid (exercises tiling + megacore split).
    x3 = jax.random.normal(jax.random.PRNGKey(2), (3000, dim_in), dtype=jnp.float32)
    out3 = jax.block_until_ready(net(x3))
    ref3 = _reference_forward(net, x3)
    assert out3.shape == (3000, dim_out), out3.shape
    assert jnp.allclose(out3, ref3, atol=1e-4, rtol=1e-4), "mismatch vs reference (case 3)"

    print("KERNEL_OK")
</pallas_src>

<mosaic_0001>
module attributes {stable_mosaic.version = 11 : i64} {
  func.func @_mlp_fused_kernel(%arg0: i32, %arg1: memref<6x128xf32, #tpu.memory_space<vmem>>, %arg2: memref<32x6xf32, #tpu.memory_space<vmem>>, %arg3: memref<32x1xf32, #tpu.memory_space<vmem>>, %arg4: memref<26x32xf32, #tpu.memory_space<vmem>>, %arg5: memref<26x1xf32, #tpu.memory_space<vmem>>, %arg6: memref<32x26xf32, #tpu.memory_space<vmem>>, %arg7: memref<32x6xf32, #tpu.memory_space<vmem>>, %arg8: memref<32x1xf32, #tpu.memory_space<vmem>>, %arg9: memref<1x32xf32, #tpu.memory_space<vmem>>, %arg10: memref<1x1xf32, #tpu.memory_space<vmem>>, %arg11: memref<1x128xf32, #tpu.memory_space<vmem>>) attributes {dimension_semantics = [#tpu.dimension_semantics<parallel>], iteration_bounds = array<i64: 1>, scalar_prefetch = 0 : i64, scratch_operands = 0 : i64, tpu.core_type = #tpu.core_type<tc>, window_params = [{transform_indices = @transform_0, window_bounds = array<i64: 6, 128>}, {pipeline_mode = #tpu.pipeline_mode<synchronous>, transform_indices = @transform_1, window_bounds = array<i64: 32, 6>}, {pipeline_mode = #tpu.pipeline_mode<synchronous>, transform_indices = @transform_2, window_bounds = array<i64: 32, 1>}, {pipeline_mode = #tpu.pipeline_mode<synchronous>, transform_indices = @transform_3, window_bounds = array<i64: 26, 32>}, {pipeline_mode = #tpu.pipeline_mode<synchronous>, transform_indices = @transform_4, window_bounds = array<i64: 26, 1>}, {pipeline_mode = #tpu.pipeline_mode<synchronous>, transform_indices = @transform_5, window_bounds = array<i64: 32, 26>}, {pipeline_mode = #tpu.pipeline_mode<synchronous>, transform_indices = @transform_6, window_bounds = array<i64: 32, 6>}, {pipeline_mode = #tpu.pipeline_mode<synchronous>, transform_indices = @transform_7, window_bounds = array<i64: 32, 1>}, {pipeline_mode = #tpu.pipeline_mode<synchronous>, transform_indices = @transform_8, window_bounds = array<i64: 1, 32>}, {pipeline_mode = #tpu.pipeline_mode<synchronous>, transform_indices = @transform_9, window_bounds = array<i64: 1, 1>}, {transform_indices = @transform_10, window_bounds = array<i64: 1, 128>}]} {
    %c0 = arith.constant 0 : index
    %c0_0 = arith.constant 0 : index
    %0 = vector.load %arg1[%c0, %c0_0] : memref<6x128xf32, #tpu.memory_space<vmem>>, vector<6x128xf32>
    %c0_1 = arith.constant 0 : index
    %c0_2 = arith.constant 0 : index
    %1 = vector.load %arg2[%c0_1, %c0_2] : memref<32x6xf32, #tpu.memory_space<vmem>>, vector<32x6xf32>
    %c0_3 = arith.constant 0 : index
    %c0_4 = arith.constant 0 : index
    %2 = vector.load %arg3[%c0_3, %c0_4] : memref<32x1xf32, #tpu.memory_space<vmem>>, vector<32x1xf32>
    %cst = arith.constant dense<0.000000e+00> : vector<32x128xf32>
    %3 = tpu.matmul %1, %0, %cst {dimension_numbers = #tpu.dot_dimension_numbers<[1], [0], [0], [1], [0, 0, 1, 1], [], []>} : vector<32x6xf32>, vector<6x128xf32>, vector<32x128xf32> -> vector<32x128xf32>
    %4 = vector.broadcast %2 : vector<32x1xf32> to vector<32x128xf32>
    %5 = arith.addf %3, %4 : vector<32x128xf32>
    %cst_5 = arith.constant 1.000000e+02 : f32
    %6 = vector.broadcast %cst_5 : f32 to vector<32x128xf32>
    %7 = arith.mulf %6, %5 : vector<32x128xf32>
    %cst_6 = arith.constant 2.000000e+01 : f32
    %8 = vector.broadcast %cst_6 : f32 to vector<32x128xf32>
    %9 = arith.minimumf %7, %8 : vector<32x128xf32>
    %10 = math.exp %9 : vector<32x128xf32>
    %11 = math.log1p %10 : vector<32x128xf32>
    %cst_7 = arith.constant 0.00999999977 : f32
    %12 = vector.broadcast %cst_7 : f32 to vector<32x128xf32>
    %13 = arith.mulf %11, %12 : vector<32x128xf32>
    %cst_8 = arith.constant 2.000000e+01 : f32
    %14 = vector.broadcast %cst_8 : f32 to vector<32x128xf32>
    %15 = arith.cmpf ogt, %7, %14 : vector<32x128xf32>
    %16 = arith.select %15, %5, %13 : vector<32x128xi1>, vector<32x128xf32>
    %c0_9 = arith.constant 0 : index
    %c0_10 = arith.constant 0 : index
    %17 = vector.load %arg4[%c0_9, %c0_10] : memref<26x32xf32, #tpu.memory_space<vmem>>, vector<26x32xf32>
    %c0_11 = arith.constant 0 : index
    %c0_12 = arith.constant 0 : index
    %18 = vector.load %arg5[%c0_11, %c0_12] : memref<26x1xf32, #tpu.memory_space<vmem>>, vector<26x1xf32>
    %cst_13 = arith.constant dense<0.000000e+00> : vector<26x128xf32>
    %19 = tpu.matmul %17, %16, %cst_13 {dimension_numbers = #tpu.dot_dimension_numbers<[1], [0], [0], [1], [0, 0, 1, 1], [], []>} : vector<26x32xf32>, vector<32x128xf32>, vector<26x128xf32> -> vector<26x128xf32>
    %20 = vector.broadcast %18 : vector<26x1xf32> to vector<26x128xf32>
    %21 = arith.addf %19, %20 : vector<26x128xf32>
    %cst_14 = arith.constant 1.000000e+02 : f32
    %22 = vector.broadcast %cst_14 : f32 to vector<26x128xf32>
    %23 = arith.mulf %22, %21 : vector<26x128xf32>
    %cst_15 = arith.constant 2.000000e+01 : f32
    %24 = vector.broadcast %cst_15 : f32 to vector<26x128xf32>
    %25 = arith.minimumf %23, %24 : vector<26x128xf32>
    %26 = math.exp %25 : vector<26x128xf32>
    %27 = math.log1p %26 : vector<26x128xf32>
    %cst_16 = arith.constant 0.00999999977 : f32
    %28 = vector.broadcast %cst_16 : f32 to vector<26x128xf32>
    %29 = arith.mulf %27, %28 : vector<26x128xf32>
    %cst_17 = arith.constant 2.000000e+01 : f32
    %30 = vector.broadcast %cst_17 : f32 to vector<26x128xf32>
    %31 = arith.cmpf ogt, %23, %30 : vector<26x128xf32>
    %32 = arith.select %31, %21, %29 : vector<26x128xi1>, vector<26x128xf32>
    %c0_18 = arith.constant 0 : index
    %c0_19 = arith.constant 0 : index
    %33 = vector.load %arg6[%c0_18, %c0_19] : memref<32x26xf32, #tpu.memory_space<vmem>>, vector<32x26xf32>
    %c0_20 = arith.constant 0 : index
    %c0_21 = arith.constant 0 : index
    %34 = vector.load %arg7[%c0_20, %c0_21] : memref<32x6xf32, #tpu.memory_space<vmem>>, vector<32x6xf32>
    %c0_22 = arith.constant 0 : index
    %c0_23 = arith.constant 0 : index
    %35 = vector.load %arg8[%c0_22, %c0_23] : memref<32x1xf32, #tpu.memory_space<vmem>>, vector<32x1xf32>
    %cst_24 = arith.constant dense<0.000000e+00> : vector<32x128xf32>
    %36 = tpu.matmul %33, %32, %cst_24 {dimension_numbers = #tpu.dot_dimension_numbers<[1], [0], [0], [1], [0, 0, 1, 1], [], []>} : vector<32x26xf32>, vector<26x128xf32>, vector<32x128xf32> -> vector<32x128xf32>
    %cst_25 = arith.constant dense<0.000000e+00> : vector<32x128xf32>
    %37 = tpu.matmul %34, %0, %cst_25 {dimension_numbers = #tpu.dot_dimension_numbers<[1], [0], [0], [1], [0, 0, 1, 1], [], []>} : vector<32x6xf32>, vector<6x128xf32>, vector<32x128xf32> -> vector<32x128xf32>
    %38 = arith.addf %36, %37 : vector<32x128xf32>
    %cst_26 = arith.constant 0.707106769 : f32
    %39 = vector.broadcast %cst_26 : f32 to vector<32x128xf32>
    %40 = arith.mulf %38, %39 : vector<32x128xf32>
    %41 = vector.broadcast %35 : vector<32x1xf32> to vector<32x128xf32>
    %42 = arith.addf %40, %41 : vector<32x128xf32>
    %cst_27 = arith.constant 1.000000e+02 : f32
    %43 = vector.broadcast %cst_27 : f32 to vector<32x128xf32>
    %44 = arith.mulf %43, %42 : vector<32x128xf32>
    %cst_28 = arith.constant 2.000000e+01 : f32
    %45 = vector.broadcast %cst_28 : f32 to vector<32x128xf32>
    %46 = arith.minimumf %44, %45 : vector<32x128xf32>
    %47 = math.exp %46 : vector<32x128xf32>
    %48 = math.log1p %47 : vector<32x128xf32>
    %cst_29 = arith.constant 0.00999999977 : f32
    %49 = vector.broadcast %cst_29 : f32 to vector<32x128xf32>
    %50 = arith.mulf %48, %49 : vector<32x128xf32>
    %cst_30 = arith.constant 2.000000e+01 : f32
    %51 = vector.broadcast %cst_30 : f32 to vector<32x128xf32>
    %52 = arith.cmpf ogt, %44, %51 : vector<32x128xf32>
    %53 = arith.select %52, %42, %50 : vector<32x128xi1>, vector<32x128xf32>
    %c0_31 = arith.constant 0 : index
    %c0_32 = arith.constant 0 : index
    %54 = vector.load %arg9[%c0_31, %c0_32] : memref<1x32xf32, #tpu.memory_space<vmem>>, vector<1x32xf32>
    %c0_33 = arith.constant 0 : index
    %c0_34 = arith.constant 0 : index
    %55 = vector.load %arg10[%c0_33, %c0_34] : memref<1x1xf32, #tpu.memory_space<vmem>>, vector<1x1xf32>
    %cst_35 = arith.constant dense<0.000000e+00> : vector<1x128xf32>
    %56 = tpu.matmul %54, %53, %cst_35 {dimension_numbers = #tpu.dot_dimension_numbers<[1], [0], [0], [1], [0, 0, 1, 1], [], []>} : vector<1x32xf32>, vector<32x128xf32>, vector<1x128xf32> -> vector<1x128xf32>
    %57 = vector.broadcast %55 : vector<1x1xf32> to vector<1x128xf32>
    %58 = arith.addf %56, %57 : vector<1x128xf32>
    %c0_36 = arith.constant 0 : index
    %c0_37 = arith.constant 0 : index
    %59 = vector.load %arg11[%c0_36, %c0_37] : memref<1x128xf32, #tpu.memory_space<vmem>>, vector<1x128xf32>
    tpu.vector_store %arg11[%c0_36, %c0_37], %58 {strides = array<i32>} : memref<1x128xf32, #tpu.memory_space<vmem>>, vector<1x128xf32>,
    return
  }
  func.func @transform_0(%arg0: i32) -> (i32, i32) {
    %c0_i32 = arith.constant 0 : i32
    %c0_i32_0 = arith.constant 0 : i32
    return %c0_i32, %arg0 : i32, i32
  }
  func.func @transform_1(%arg0: i32) -> (i32, i32) {
    %c0_i32 = arith.constant 0 : i32
    %c0_i32_0 = arith.constant 0 : i32
    %c0_i32_1 = arith.constant 0 : i32
    return %c0_i32, %c0_i32_0 : i32, i32
  }
  func.func @transform_2(%arg0: i32) -> (i32, i32) {
    %c0_i32 = arith.constant 0 : i32
    %c0_i32_0 = arith.constant 0 : i32
    %c0_i32_1 = arith.constant 0 : i32
    return %c0_i32, %c0_i32_0 : i32, i32
  }
  func.func @transform_3(%arg0: i32) -> (i32, i32) {
    %c0_i32 = arith.constant 0 : i32
    %c0_i32_0 = arith.constant 0 : i32
    %c0_i32_1 = arith.constant 0 : i32
    return %c0_i32, %c0_i32_0 : i32, i32
  }
  func.func @transform_4(%arg0: i32) -> (i32, i32) {
    %c0_i32 = arith.constant 0 : i32
    %c0_i32_0 = arith.constant 0 : i32
    %c0_i32_1 = arith.constant 0 : i32
    return %c0_i32, %c0_i32_0 : i32, i32
  }
  func.func @transform_5(%arg0: i32) -> (i32, i32) {
    %c0_i32 = arith.constant 0 : i32
    %c0_i32_0 = arith.constant 0 : i32
    %c0_i32_1 = arith.constant 0 : i32
    return %c0_i32, %c0_i32_0 : i32, i32
  }
  func.func @transform_6(%arg0: i32) -> (i32, i32) {
    %c0_i32 = arith.constant 0 : i32
    %c0_i32_0 = arith.constant 0 : i32
    %c0_i32_1 = arith.constant 0 : i32
    return %c0_i32, %c0_i32_0 : i32, i32
  }
  func.func @transform_7(%arg0: i32) -> (i32, i32) {
    %c0_i32 = arith.constant 0 : i32
    %c0_i32_0 = arith.constant 0 : i32
    %c0_i32_1 = arith.constant 0 : i32
    return %c0_i32, %c0_i32_0 : i32, i32
  }
  func.func @transform_8(%arg0: i32) -> (i32, i32) {
    %c0_i32 = arith.constant 0 : i32
    %c0_i32_0 = arith.constant 0 : i32
    %c0_i32_1 = arith.constant 0 : i32
    return %c0_i32, %c0_i32_0 : i32, i32
  }
  func.func @transform_9(%arg0: i32) -> (i32, i32) {
    %c0_i32 = arith.constant 0 : i32
    %c0_i32_0 = arith.constant 0 : i32
    %c0_i32_1 = arith.constant 0 : i32
    return %c0_i32, %c0_i32_0 : i32, i32
  }
  func.func @transform_10(%arg0: i32) -> (i32, i32) {
    %c0_i32 = arith.constant 0 : i32
    %c0_i32_0 = arith.constant 0 : i32
    return %c0_i32, %arg0 : i32, i32
  }
}

</mosaic_0001>

<bundles_post_ra>
// kernel: tpu_custom_call.1
= control target key start
LH: loop header
LB: loop body
LE: loop exit
PB: predicated region body
PF: predicated region fallthrough
CT: control target
= control target key end

     0   :  { %s887_s0 = inlined_call_operand.vmem [shape: f32[6,128], index: 0, kind: input, shape index: {}]   ;;  %s888_s1 = inlined_call_operand.vmem [shape: f32[32,6], index: 1, kind: input, shape index: {}]   ;;  %s889_s2 = inlined_call_operand.vmem [shape: f32[32,1], index: 2, kind: input, shape index: {}]   ;;  %s890_s3 = inlined_call_operand.vmem [shape: f32[26,32], index: 3, kind: input, shape index: {}]   ;;  %s891_s4 = inlined_call_operand.vmem [shape: f32[26,1], index: 4, kind: input, shape index: {}]   ;;  %s892_s5 = inlined_call_operand.vmem [shape: f32[32,26], index: 5, kind: input, shape index: {}]   ;;  %s893_s6 = inlined_call_operand.vmem [shape: f32[32,6], index: 6, kind: input, shape index: {}]   ;;  %s894_s7 = inlined_call_operand.vmem [shape: f32[32,1], index: 7, kind: input, shape index: {}]   ;;  %s895_s8 = inlined_call_operand.vmem [shape: f32[1,32], index: 8, kind: input, shape index: {}]   ;;  %s896_s9 = inlined_call_operand.<no memory space> [shape: f32[1,1], index: 9, kind: input, shape index: {}]   ;;  %s897_s10 = inlined_call_operand.hbm [shape: f32[1,128], index: 10, kind: output, shape index: {}]  }
   0x1   :  { %v15_v0 = vstv %s896_s9 }
   0x2   :  { %16 = vst [vmem:[#allocation2] sm:$0x1] %v15_v0 }
   0x3   :  { %v38_v1 = vld [vmem:[%s887_s0] sm:$0x3f]  ;;  %vm80_vm0 = vcmask 1045504   ;;  %v46_v2 = vld [vmem:[%s889_s2 + $0x18] sm:$0xff]  ;;  %v649_v4 = vmov 0   ;;  %vm67_vm1 = vcmask 48128  }
   0x4   :  { %v39_v3 = vld [vmem:[%s888_s1] sm:$0xff]  ;;  %572 = vset.pattern.permute.xlu0 %v649_v4  ;;  %550 = vmatpush.msk.msra.mxu0 %vm80_vm0, %v38_v1  ;;  %v44_v5 = vld [vmem:[%s889_s2 + $0x8] sm:$0xff] }
   0x5   :  { %64 = vperm.xlu0 %572, %v46_v2   ;;  %551 = vmatmul.msk.f32.vlgmr.msra.gmra.mxu0 %vm67_vm1, %v39_v3 }
   0x6   :  { %573 = vset.pattern.permute.xlu1 %v649_v4  ;;  %574 = vset.pattern.permute.xlu2 %v649_v4 }
   0x7   :  { %54 = vperm.xlu1 %573, %v44_v5   ;;  %559 = vmatpush.msk.msra.mxu2 %vm80_vm0, %v38_v1 }
   0x8   :  { %17 = vsyncpa [#allocation4], 0  ;;  %v45_v6 = vld [vmem:[%s889_s2 + $0x10] sm:$0xff]  ;;  %v40_v7 = vld [vmem:[%s888_s1 + $0x8] sm:$0xff]  ;;  %vm205_vm10 = vcmask 261120   ;;  %vm377_vm15 = vcmask 1041408  }
   0x9   :  { %v43_v8 = vld [vmem:[%s889_s2] sm:$0xff]  ;;  %v182_v9 = vld [vmem:[%s891_s4 + $0x8] sm:$0xff]  ;;  %v41_v10 = vld [vmem:[%s888_s1 + $0x10] sm:$0xff]  ;;  %s650_s9 = smov [#allocation3]   ;;  %s541_s24 = sshll.u32 %s897_s10, 4  ;;  %s542_s24 = int_to_ptr.hbm [resolvable:$true] %s541_s24 }
   0xa   :  { %v181_v11 = vld [vmem:[%s891_s4] sm:$0xff]  ;;  %v321_v12 = vld [vmem:[%s894_s7 + $0x10] sm:$0xff]  ;;  %v42_v13 = vld [vmem:[%s888_s1 + $0x18] sm:$0xff]  ;;  %s539_s0 = sshll.u32 %s650_s9, 4  ;;  %s540_s0 = int_to_ptr.vmem [resolvable:$true] %s539_s0 }
   0xb   :  { %v320_v14 = vld [vmem:[%s894_s7 + $0x8] sm:$0xff]  ;;  %v503_v15 = vld [vmem:[#allocation2] sm:$0x1] }
   0xd   :  { %59 = vperm.xlu0 %572, %v45_v6   ;;  %552 = vmatmul.msk.f32.gmra.mxu0 %vm67_vm1, %v40_v7 }
   0xf   :  { %49 = vperm.xlu1 %573, %v43_v8  }
  0x15   :  { %192 = vperm.xlu0 %572, %v182_v9   ;;  %553 = vmatmul.msk.f32.gmra.mxu0 %vm67_vm1, %v41_v10 }
  0x17   :  { %187 = vperm.xlu1 %573, %v181_v11  }
  0x1d   :  { %426 = vperm.xlu0 %572, %v321_v12   ;;  %554 = vmatmul.msk.f32.gmra.mxu0 %vm67_vm1, %v42_v13 }
  0x1f   :  { %421 = vperm.xlu1 %573, %v320_v14  }
  0x25   :  { %506 = vperm.xlu0 %572, %v503_v15  }
  0x77   :  { %v65_v18 = vpop.permute.xlu0 %64 }
  0x79   :  { %v55_v16 = vpop.permute.xlu1 %54 }
  0x7f   :  { %v60_v25 = vpop.permute.xlu0 %59 }
  0x81   :  { %v50_v19 = vpop.permute.xlu1 %49 }
  0x82   :  { %v101_v17 = vpop.f32.mrf.mxu0 }
  0x83   :  { %v754_v22 = vadd.f32 %v101_v17, %v50_v19 }
  0x85   :  { %v760_v24 = vmul.f32 100.0, %v754_v22 }
  0x87   :  { %v117_v29 = vmin.f32 %v760_v24, 20.0  ;;  %vm169_vm9 = vcmp.gt.f32.partialorder %v760_v24, 20.0  ;;  %v319_v24 = vld [vmem:[%s894_s7] sm:$0xff] }
  0x89   :  { %v121_v33 = vmul.f32 1.442695, %v117_v29 }
  0x8a   :  { %v104_v20 = vpop.f32.mrf.mxu0 }
  0x8b   :  { %v752_v21 = vadd.f32 %v104_v20, %v55_v16  ;;  %v184_v16 = vld [vmem:[%s891_s4 + $0x18] sm:$0x3]  ;;  %v177_v20 = vld [vmem:[%s890_s3] sm:$0xff] }
  0x8c   :  { %202 = vperm.xlu2 %574, %v184_v16  }
  0x8d   :  { %v757_v23 = vmul.f32 100.0, %v752_v21 }
  0x8f   :  { %v118_v26 = vmin.f32 %v757_v23, 20.0  ;;  %vm170_vm8 = vcmp.gt.f32.partialorder %v757_v23, 20.0  ;;  %v322_v23 = vld [vmem:[%s894_s7 + $0x18] sm:$0xff] }
  0x91   :  { %v123_v31 = vmul.f32 1.442695, %v118_v26  ;;  %v183_v26 = vld [vmem:[%s891_s4 + $0x10] sm:$0xff] }
  0x92   :  { %v107_v27 = vpop.f32.mrf.mxu0 }
  0x93   :  { %v763_v28 = vadd.f32 %v107_v27, %v60_v25  ;;  %575 = vpow2.f32 %v123_v31  ;;  %v180_v27 = vld [vmem:[%s890_s3 + $0x18] sm:$0x3] }
  0x94   :  { %197 = vperm.xlu2 %574, %v183_v26  }
  0x95   :  { %v767_v30 = vmul.f32 100.0, %v763_v28 }
  0x97   :  { %v119_v32 = vmin.f32 %v767_v30, 20.0  ;;  %vm171_vm7 = vcmp.gt.f32.partialorder %v767_v30, 20.0  ;;  %v193_v30 = vpop.permute.xlu0 %192 }
  0x99   :  { %v125_v34 = vmul.f32 1.442695, %v119_v32  ;;  %v576_v39 = vpop.eup %575  ;;  %v188_v32 = vpop.permute.xlu1 %187 }
  0x9a   :  { %v110_v35 = vpop.f32.mrf.mxu0  ;;  %v138_v44 = vadd.f32 1.0, %v576_v39  ;;  %v141_v50 = vmul.f32 -0.5, %v576_v39  ;;  %v144_v61 = vand.u32 2147483647, %v576_v39 }
  0x9b   :  { %577 = vpow2.f32 %v125_v34  ;;  %v111_v36 = vadd.f32 %v110_v35, %v65_v18 }
  0x9c   :  { %579 = vpow2.f32 %v121_v33  ;;  %v142_v59 = vadd.f32 1.0, %v141_v50  ;;  %vm145_vm4 = vcmp.lt.f32.partialorder %v144_v61, 0.0004427343  ;;  %431 = vperm.xlu2 %574, %v322_v23  }
  0x9d   :  { %v116_v37 = vmul.f32 100.0, %v111_v36 }
  0x9e   :  { %v143_v7 = vmul.f32 %v576_v39, %v142_v59  ;;  %v316_v59 = vld [vmem:[%s893_s6 + $0x8] sm:$0xff] }
  0x9f   :  { %v120_v38 = vmin.f32 %v116_v37, 20.0  ;;  %vm172_vm6 = vcmp.gt.f32.partialorder %v116_v37, 20.0 }
  0xa1   :  { %v578_v40 = vpop.eup %577  ;;  %v127_v41 = vmul.f32 1.442695, %v120_v38 }
  0xa2   :  { %v580_v42 = vpop.eup %579  ;;  %v147_v43 = vadd.f32 1.0, %v578_v40  ;;  %v150_v47 = vmul.f32 -0.5, %v578_v40  ;;  %v153_v55 = vand.u32 2147483647, %v578_v40 }
  0xa3   :  { %581 = vpow2.f32 %v127_v41  ;;  %v129_v45 = vadd.f32 1.0, %v580_v42  ;;  %v132_v53 = vmul.f32 -0.5, %v580_v42  ;;  %v135_v3 = vand.u32 2147483647, %v580_v42 }
  0xa4   :  { %583 = vlog2.f32 %v147_v43  ;;  %v151_v52 = vadd.f32 1.0, %v150_v47  ;;  %vm154_vm2 = vcmp.lt.f32.partialorder %v153_v55, 0.0004427343  ;;  %416 = vperm.xlu2 %574, %v319_v24   ;;  %v318_v24 = vld [vmem:[%s893_s6 + $0x18] sm:$0xff] }
  0xa5   :  { %585 = vlog2.f32 %v138_v44  ;;  %v133_v0 = vadd.f32 1.0, %v132_v53  ;;  %vm136_vm5 = vcmp.lt.f32.partialorder %v135_v3, 0.0004427343 }
  0xa6   :  { %587 = vlog2.f32 %v129_v45  ;;  %v152_v62 = vmul.f32 %v578_v40, %v151_v52 }
  0xa7   :  { %v134_v10 = vmul.f32 %v580_v42, %v133_v0 }
  0xa9   :  { %v582_v46 = vpop.eup %581 }
  0xaa   :  { %v156_v48 = vadd.f32 1.0, %v582_v46  ;;  %v159_v49 = vmul.f32 -0.5, %v582_v46  ;;  %v584_v51 = vpop.eup %583  ;;  %v162_v60 = vand.u32 2147483647, %v582_v46 }
  0xab   :  { %v586_v54 = vpop.eup %585  ;;  %v149_v58 = vmul.f32 0.6931472, %v584_v51  ;;  %v315_v51 = vld [vmem:[%s893_s6] sm:$0xff] }
  0xac   :  { %589 = vlog2.f32 %v156_v48  ;;  %v588_v56 = vpop.eup %587  ;;  %v160_v57 = vadd.f32 1.0, %v159_v49  ;;  %v140_v63 = vmul.f32 0.6931472, %v586_v54  ;;  %vm163_vm3 = vcmp.lt.f32.partialorder %v162_v60, 0.0004427343  ;;  %560 = vmatmul.msk.f32.vlgmr.msra.gmra.mxu2 %vm67_vm1, %v315_v51 }
  0xad   :  { %v131_v2 = vmul.f32 0.6931472, %v588_v56  ;;  %v155_v6 = vsel %vm154_vm2, %v152_v62, %v149_v58 }
  0xae   :  { %v161_v5 = vmul.f32 %v582_v46, %v160_v57  ;;  %v146_v9 = vsel %vm145_vm4, %v143_v7, %v140_v63  ;;  %v167_v12 = vmul.f32 0.01, %v155_v6 }
  0xaf   :  { %v137_v13 = vsel %vm136_vm5, %v134_v10, %v131_v2  ;;  %v166_v15 = vmul.f32 0.01, %v146_v9  ;;  %vm364_vm5 = vcmask 211968  }
  0xb0   :  { %v175_v17 = vsel %vm171_vm7, %v763_v28, %v167_v12  ;;  %v165_v18 = vmul.f32 0.01, %v137_v13 }
  0xb1   :  { %v174_v19 = vsel %vm170_vm8, %v752_v21, %v166_v15  ;;  %v178_v21 = vld [vmem:[%s890_s3 + $0x8] sm:$0xff] }
  0xb2   :  { %v590_v1 = vpop.eup %589  ;;  %v173_v25 = vsel %vm169_vm9, %v754_v22, %v165_v18  ;;  %v179_v22 = vld [vmem:[%s890_s3 + $0x10] sm:$0xff] }
  0xb3   :  { %v158_v4 = vmul.f32 0.6931472, %v590_v1 }
  0xb4   :  { %561 = vmatmul.msk.f32.gmra.mxu2 %vm67_vm1, %v316_v59  ;;  %v427_v59 = vpop.permute.xlu0 %426 }
  0xb5   :  { %v164_v8 = vsel %vm163_vm3, %v161_v5, %v158_v4  ;;  %v317_v4 = vld [vmem:[%s893_s6 + $0x10] sm:$0xff] }
  0xb6   :  { %v168_v11 = vmul.f32 0.01, %v164_v8 }
  0xb8   :  { %v176_v14 = vsel %vm172_vm6, %v111_v36, %v168_v11 }
  0xb9   :  { %230 = vmatpush.msra.mxu1 %v176_v14 }
  0xbb   :  { %231 = vmatpush.msra.mxu1 %v175_v17 }
  0xbc   :  { %562 = vmatmul.msk.f32.gmra.mxu2 %vm67_vm1, %v317_v4 }
  0xbd   :  { %232 = vmatpush.msra.mxu1 %v174_v19 }
  0xbf   :  { %233 = vmatpush.msra.mxu1 %v173_v25 }
  0xc0   :  { %555 = vmatmul.msk.f32.vlgmr.msra.gmra.mxu1 %vm205_vm10, %v177_v20 }
  0xc4   :  { %563 = vmatmul.msk.f32.gmra.mxu2 %vm67_vm1, %v318_v24 }
  0xc8   :  { %556 = vmatmul.msk.f32.gmra.mxu1 %vm205_vm10, %v178_v21 }
  0xd0   :  { %557 = vmatmul.msk.f32.gmra.mxu1 %vm205_vm10, %v179_v22 }
  0xd8   :  { %558 = vmatmul.msk.f32.gmra.mxu1 %vm205_vm10, %v180_v27 }
  0xe6   :  { %v203_v29 = vpop.permute.xlu2 %202 }
  0xee   :  { %v198_v37 = vpop.permute.xlu2 %197 }
 0x13d   :  { %v235_v28 = vpop.f32.mrf.mxu1 }
 0x13e   :  { %v806_v34 = vadd.f32 %v235_v28, %v188_v32 }
 0x140   :  { %v812_v36 = vmul.f32 100.0, %v806_v34 }
 0x142   :  { %v251_v41 = vmin.f32 %v812_v36, 20.0  ;;  %vm303_vm4 = vcmp.gt.f32.partialorder %v812_v36, 20.0  ;;  %v352_v36 = vpop.f32.mrf.mxu2 }
 0x144   :  { %v255_v45 = vmul.f32 1.442695, %v251_v41 }
 0x145   :  { %v238_v31 = vpop.f32.mrf.mxu1 }
 0x146   :  { %v804_v33 = vadd.f32 %v238_v31, %v193_v30 }
 0x148   :  { %v809_v35 = vmul.f32 100.0, %v804_v33 }
 0x14a   :  { %v252_v38 = vmin.f32 %v809_v35, 20.0  ;;  %vm304_vm3 = vcmp.gt.f32.partialorder %v809_v35, 20.0  ;;  %v314_v35 = vld [vmem:[%s892_s5 + $0x18] sm:$0xff] }
 0x14c   :  { %v257_v43 = vmul.f32 1.442695, %v252_v38 }
 0x14d   :  { %v241_v39 = vpop.f32.mrf.mxu1 }
 0x14e   :  { %v815_v40 = vadd.f32 %v241_v39, %v198_v37  ;;  %591 = vpow2.f32 %v257_v43  ;;  %v311_v39 = vld [vmem:[%s892_s5] sm:$0xff]  ;;  %v432_v43 = vpop.permute.xlu2 %431 }
 0x150   :  { %v819_v42 = vmul.f32 100.0, %v815_v40 }
 0x152   :  { %v253_v44 = vmin.f32 %v819_v42, 20.0  ;;  %vm305_vm2 = vcmp.gt.f32.partialorder %v819_v42, 20.0 }
 0x154   :  { %v259_v46 = vmul.f32 1.442695, %v253_v44  ;;  %v592_v52 = vpop.eup %591 }
 0x155   :  { %v244_v47 = vpop.f32.mrf.mxu1  ;;  %v272_v57 = vadd.f32 1.0, %v592_v52  ;;  %v275_v0 = vmul.f32 -0.5, %v592_v52  ;;  %v278_v12 = vand.u32 2147483647, %v592_v52 }
 0x156   :  { %593 = vpow2.f32 %v259_v46  ;;  %v245_v48 = vadd.f32 %v244_v47, %v203_v29  ;;  %v417_v51 = vpop.permute.xlu2 %416 }
 0x157   :  { %595 = vpow2.f32 %v255_v45  ;;  %v276_v10 = vadd.f32 1.0, %v275_v0  ;;  %vm279_vm13 = vcmp.lt.f32.partialorder %v278_v12, 0.0004427343 }
 0x158   :  { %v250_v49 = vmul.f32 100.0, %v245_v48 }
 0x159   :  { %v277_v26 = vmul.f32 %v592_v52, %v276_v10 }
 0x15a   :  { %v254_v50 = vmin.f32 %v250_v49, 20.0  ;;  %vm306_vm0 = vcmp.gt.f32.partialorder %v250_v49, 20.0  ;;  %v422_v49 = vpop.permute.xlu1 %421 }
 0x15c   :  { %v594_v53 = vpop.eup %593  ;;  %v261_v54 = vmul.f32 1.442695, %v254_v50 }
 0x15d   :  { %v596_v55 = vpop.eup %595  ;;  %v281_v56 = vadd.f32 1.0, %v594_v53  ;;  %v284_v61 = vmul.f32 -0.5, %v594_v53  ;;  %v287_v6 = vand.u32 2147483647, %v594_v53 }
 0x15e   :  { %597 = vpow2.f32 %v261_v54  ;;  %v263_v58 = vadd.f32 1.0, %v596_v55  ;;  %v266_v3 = vmul.f32 -0.5, %v596_v55  ;;  %v269_v16 = vand.u32 2147483647, %v596_v55 }
 0x15f   :  { %599 = vlog2.f32 %v281_v56  ;;  %v285_v2 = vadd.f32 1.0, %v284_v61  ;;  %vm288_vm11 = vcmp.lt.f32.partialorder %v287_v6, 0.0004427343 }
 0x160   :  { %601 = vlog2.f32 %v272_v57  ;;  %v267_v15 = vadd.f32 1.0, %v266_v3  ;;  %vm270_vm14 = vcmp.lt.f32.partialorder %v269_v16, 0.0004427343 }
 0x161   :  { %603 = vlog2.f32 %v263_v58  ;;  %v286_v13 = vmul.f32 %v594_v53, %v285_v2 }
 0x162   :  { %v268_v22 = vmul.f32 %v596_v55, %v267_v15 }
 0x164   :  { %v598_v60 = vpop.eup %597 }
 0x165   :  { %v290_v62 = vadd.f32 1.0, %v598_v60  ;;  %v293_v63 = vmul.f32 -0.5, %v598_v60  ;;  %v600_v1 = vpop.eup %599  ;;  %v296_v11 = vand.u32 2147483647, %v598_v60 }
 0x166   :  { %v602_v5 = vpop.eup %601  ;;  %v283_v9 = vmul.f32 0.6931472, %v600_v1 }
 0x167   :  { %605 = vlog2.f32 %v290_v62  ;;  %v604_v7 = vpop.eup %603  ;;  %v294_v8 = vadd.f32 1.0, %v293_v63  ;;  %v274_v14 = vmul.f32 0.6931472, %v602_v5  ;;  %vm297_vm12 = vcmp.lt.f32.partialorder %v296_v11, 0.0004427343 }
 0x168   :  { %v265_v18 = vmul.f32 0.6931472, %v604_v7  ;;  %v289_v25 = vsel %vm288_vm11, %v286_v13, %v283_v9 }
 0x169   :  { %v295_v20 = vmul.f32 %v598_v60, %v294_v8  ;;  %v280_v23 = vsel %vm279_vm13, %v277_v26, %v274_v14  ;;  %v301_v28 = vmul.f32 0.01, %v289_v25 }
 0x16a   :  { %v271_v29 = vsel %vm270_vm14, %v268_v22, %v265_v18  ;;  %v300_v31 = vmul.f32 0.01, %v280_v23 }
 0x16b   :  { %v309_v32 = vsel %vm305_vm2, %v815_v40, %v301_v28  ;;  %v299_v37 = vmul.f32 0.01, %v271_v29  ;;  %v312_v40 = vld [vmem:[%s892_s5 + $0x8] sm:$0xff] }
 0x16c   :  { %v308_v38 = vsel %vm304_vm3, %v804_v33, %v300_v31  ;;  %v313_v33 = vld [vmem:[%s892_s5 + $0x10] sm:$0xff] }
 0x16d   :  { %v606_v17 = vpop.eup %605  ;;  %v307_v41 = vsel %vm303_vm4, %v806_v34, %v299_v37  ;;  %v355_v34 = vpop.f32.mrf.mxu2 }
 0x16e   :  { %v292_v19 = vmul.f32 0.6931472, %v606_v17 }
 0x170   :  { %v298_v21 = vsel %vm297_vm12, %v295_v20, %v292_v19 }
 0x171   :  { %v302_v27 = vmul.f32 0.01, %v298_v21 }
 0x173   :  { %v310_v30 = vsel %vm306_vm0, %v245_v48, %v302_v27 }
 0x174   :  { %564 = vmatpush.msk.msra.mxu3 %vm377_vm15, %v310_v30 }
 0x175   :  { %v358_v50 = vpop.f32.mrf.mxu2 }
 0x176   :  { %394 = vmatpush.msra.mxu3 %v309_v32 }
 0x178   :  { %395 = vmatpush.msra.mxu3 %v308_v38 }
 0x17a   :  { %396 = vmatpush.msra.mxu3 %v307_v41 }
 0x17b   :  { %565 = vmatmul.msk.f32.vlgmr.msra.gmra.mxu3 %vm364_vm5, %v311_v39 }
 0x17d   :  { %v361_v62 = vpop.f32.mrf.mxu2 }
 0x183   :  { %566 = vmatmul.msk.f32.gmra.mxu3 %vm364_vm5, %v312_v40 }
 0x18b   :  { %567 = vmatmul.msk.f32.gmra.mxu3 %vm364_vm5, %v313_v33 }
 0x193   :  { %568 = vmatmul.msk.f32.gmra.mxu3 %vm364_vm5, %v314_v35 }
 0x1fe   :  { %v398_v42 = vpop.f32.mrf.mxu3 }
 0x1ff   :  { %v399_v44 = vadd.f32 %v398_v42, %v352_v36 }
 0x201   :  { %v410_v47 = vmul.f32 0.70710677, %v399_v44 }
 0x203   :  { %v858_v53 = vadd.f32 %v417_v51, %v410_v47 }
 0x205   :  { %v864_v57 = vmul.f32 100.0, %v858_v53 }
 0x206   :  { %v401_v45 = vpop.f32.mrf.mxu3 }
 0x207   :  { %v402_v46 = vadd.f32 %v401_v45, %v355_v34  ;;  %v442_v63 = vmin.f32 %v864_v57, 20.0  ;;  %vm494_vm13 = vcmp.gt.f32.partialorder %v864_v57, 20.0 }
 0x209   :  { %v411_v48 = vmul.f32 0.70710677, %v402_v46  ;;  %v446_v5 = vmul.f32 1.442695, %v442_v63 }
 0x20b   :  { %v856_v52 = vadd.f32 %v422_v49, %v411_v48 }
 0x20d   :  { %v861_v55 = vmul.f32 100.0, %v856_v52 }
 0x20e   :  { %v404_v54 = vpop.f32.mrf.mxu3 }
 0x20f   :  { %v405_v56 = vadd.f32 %v404_v54, %v358_v50  ;;  %v443_v60 = vmin.f32 %v861_v55, 20.0  ;;  %vm495_vm12 = vcmp.gt.f32.partialorder %v861_v55, 20.0 }
 0x211   :  { %v412_v58 = vmul.f32 0.70710677, %v405_v56  ;;  %v448_v2 = vmul.f32 1.442695, %v443_v60 }
 0x213   :  { %v867_v61 = vadd.f32 %v427_v59, %v412_v58  ;;  %607 = vpow2.f32 %v448_v2  ;;  %v502_v59 = vld [vmem:[%s895_s8] sm:$0x1] }
 0x215   :  { %v871_v0 = vmul.f32 100.0, %v867_v61 }
 0x216   :  { %v407_v1 = vpop.f32.mrf.mxu3 }
 0x217   :  { %v408_v3 = vadd.f32 %v407_v1, %v361_v62  ;;  %v444_v4 = vmin.f32 %v871_v0, 20.0  ;;  %vm496_vm11 = vcmp.gt.f32.partialorder %v871_v0, 20.0  ;;  %v507_v62 = vpop.permute.xlu0 %506 }
 0x219   :  { %v413_v6 = vmul.f32 0.70710677, %v408_v3  ;;  %v450_v7 = vmul.f32 1.442695, %v444_v4  ;;  %v608_v11 = vpop.eup %607 }
 0x21a   :  { %v463_v16 = vadd.f32 1.0, %v608_v11  ;;  %v466_v26 = vmul.f32 -0.5, %v608_v11  ;;  %v469_v37 = vand.u32 2147483647, %v608_v11 }
 0x21b   :  { %v437_v8 = vadd.f32 %v432_v43, %v413_v6  ;;  %609 = vpow2.f32 %v450_v7 }
 0x21c   :  { %611 = vpow2.f32 %v446_v5  ;;  %v467_v31 = vadd.f32 1.0, %v466_v26  ;;  %vm470_vm7 = vcmp.lt.f32.partialorder %v469_v37, 0.0004427343 }
 0x21d   :  { %v441_v9 = vmul.f32 100.0, %v437_v8 }
 0x21e   :  { %v468_v43 = vmul.f32 %v608_v11, %v467_v31 }
 0x21f   :  { %v445_v10 = vmin.f32 %v441_v9, 20.0  ;;  %vm497_vm9 = vcmp.gt.f32.partialorder %v441_v9, 20.0 }
 0x221   :  { %v610_v12 = vpop.eup %609  ;;  %v452_v13 = vmul.f32 1.442695, %v445_v10 }
 0x222   :  { %v612_v14 = vpop.eup %611  ;;  %v472_v15 = vadd.f32 1.0, %v610_v12  ;;  %v475_v19 = vmul.f32 -0.5, %v610_v12  ;;  %v478_v27 = vand.u32 2147483647, %v610_v12 }
 0x223   :  { %613 = vpow2.f32 %v452_v13  ;;  %v454_v17 = vadd.f32 1.0, %v612_v14  ;;  %v457_v22 = vmul.f32 -0.5, %v612_v14  ;;  %v460_v35 = vand.u32 2147483647, %v612_v14 }
 0x224   :  { %615 = vlog2.f32 %v472_v15  ;;  %v476_v23 = vadd.f32 1.0, %v475_v19  ;;  %vm479_vm1 = vcmp.lt.f32.partialorder %v478_v27, 0.0004427343 }
 0x225   :  { %617 = vlog2.f32 %v463_v16  ;;  %v458_v41 = vadd.f32 1.0, %v457_v22  ;;  %vm461_vm8 = vcmp.lt.f32.partialorder %v460_v35, 0.0004427343 }
 0x226   :  { %619 = vlog2.f32 %v454_v17  ;;  %v477_v38 = vmul.f32 %v610_v12, %v476_v23 }
 0x227   :  { %v459_v46 = vmul.f32 %v612_v14, %v458_v41 }
 0x229   :  { %v614_v18 = vpop.eup %613 }
 0x22a   :  { %v481_v20 = vadd.f32 1.0, %v614_v18  ;;  %v484_v25 = vmul.f32 -0.5, %v614_v18  ;;  %v616_v21 = vpop.eup %615  ;;  %v487_v32 = vand.u32 2147483647, %v614_v18 }
 0x22b   :  { %v618_v24 = vpop.eup %617  ;;  %v474_v30 = vmul.f32 0.6931472, %v616_v21 }
 0x22c   :  { %621 = vlog2.f32 %v481_v20  ;;  %v620_v28 = vpop.eup %619  ;;  %v485_v29 = vadd.f32 1.0, %v484_v25  ;;  %v465_v39 = vmul.f32 0.6931472, %v618_v24  ;;  %vm488_vm6 = vcmp.lt.f32.partialorder %v487_v32, 0.0004427343 }
 0x22d   :  { %v456_v33 = vmul.f32 0.6931472, %v620_v28  ;;  %v480_v34 = vsel %vm479_vm1, %v477_v38, %v474_v30 }
 0x22e   :  { %v486_v42 = vmul.f32 %v614_v18, %v485_v29  ;;  %v471_v45 = vsel %vm470_vm7, %v468_v43, %v465_v39  ;;  %v492_v48 = vmul.f32 0.01, %v480_v34 }
 0x22f   :  { %v462_v49 = vsel %vm461_vm8, %v459_v46, %v456_v33  ;;  %v491_v51 = vmul.f32 0.01, %v471_v45 }
 0x230   :  { %v500_v54 = vsel %vm496_vm11, %v867_v61, %v492_v48  ;;  %v490_v56 = vmul.f32 0.01, %v462_v49 }
 0x231   :  { %v499_v58 = vsel %vm495_vm12, %v856_v52, %v491_v51  ;;  %v509_v52 = vperm.slane %v507_v62, 0 }
 0x232   :  { %v622_v40 = vpop.eup %621  ;;  %v498_v60 = vsel %vm494_vm13, %v858_v53, %v490_v56 }
 0x233   :  { %v483_v36 = vmul.f32 0.6931472, %v622_v40 }
 0x235   :  { %v489_v44 = vsel %vm488_vm6, %v486_v42, %v483_v36 }
 0x236   :  { %v493_v47 = vmul.f32 0.01, %v489_v44 }
 0x238   :  { %v501_v50 = vsel %vm497_vm9, %v437_v8, %v493_v47 }
 0x239   :  { %525 = vmatpush.msrb.mxu0 %v501_v50 }
 0x23b   :  { %526 = vmatpush.msrb.mxu0 %v500_v54 }
 0x23d   :  { %527 = vmatpush.msrb.mxu0 %v499_v58 }
 0x23f   :  { %528 = vmatpush.msrb.mxu0 %v498_v60 }
 0x240   :  { %569 = vmatmul.msk.f32.vlgmr.msrb.gmra.mxu0 %vm205_vm10, %v502_v59 }
 0x2bd   :  { %v530_v55 = vpop.f32.mrf.mxu0 }
 0x2be   :  { %v531_v61 = vadd.f32 %v530_v55, %v509_v52 }
 0x2c0   :  { %533 = vst [vmem:[#allocation3] sm:$0x1] %v531_v61 }
 0x2c1   :  { %544 = dma.vmem_to_hbm [thread:$0]  %s540_s0, 16, %s542_s24, [#allocation4]  }
 0x2c2   :  { %647 = dma.done.wait [#allocation4], 16  }
 0x2c3   :  { %648 = vsyncadd [#allocation4], 4294967280 }
 0x2c4   :  { %549 = vsyncpa [#allocation4], 1 }

</bundles_post_ra>
